<compile_context>
chip_gen: v5e
topology: v5e:2x2
jax: 0.10.0
libtpu: 0.0.40
codegen_flags: <defaults>
</compile_context>

<pallas_src>
import functools

import jax
import jax.numpy as jnp
from jax.experimental import pallas as pl
from jax.experimental.pallas import tpu as pltpu


def _shortcut_kernel(w1_ref, w2_ref, xe_ref, lat_ref, o_ref, *, channels):
    """Per-pixel block-diagonal channel mix + residual add (pure VPU).

    w1_ref : (C,)  f32, SMEM — conv_1 weight for input channel c (= w1[g, c%4])
    w2_ref : (C,)  f32, SMEM — conv_2 weight for output channel c
    xe_ref : (RB, TL) VMEM   — stride-sampled x embedded on the output grid
    lat_ref: (RB, TL) VMEM   — residual x_latter, same layout
    o_ref  : (RB, TL) VMEM   — output

    Rows are batch-major / channel-minor and RB is a multiple of C, so the
    local row r carries channel r % C; channel groups of 4 are contiguous.
    The lane axis is the large flattened spatial extent.
    """
    rows = xe_ref.shape[0]
    for base in range(0, rows, 4):            # one conv group per 4 rows
        c0 = base % channels
        s = (w1_ref[c0 + 0] * xe_ref[base + 0:base + 1, :]
             + w1_ref[c0 + 1] * xe_ref[base + 1:base + 2, :]
             + w1_ref[c0 + 2] * xe_ref[base + 2:base + 3, :]
             + w1_ref[c0 + 3] * xe_ref[base + 3:base + 4, :])
        for k in range(4):
            r = base + k
            o_ref[r:r + 1, :] = (w2_ref[c0 + k] * s
                                 + lat_ref[r:r + 1, :]).astype(o_ref.dtype)


def shortcut_block(x, x_latter, w1, w2, stride=1):
    """Forward pass of ShortCutBlock (grouped 1x1 convs, padding=1, no bias).

    x        : (N, C, H, W)            NCHW
    x_latter : (N, C, H1+2, W1+2)      NCHW residual, H1 = (H+1)//stride + 1
    w1       : (G, 4)  conv_1 weights, G = C // 4 (one out channel per group)
    w2       : (C,)    conv_2 weights (4 out channels per group, 1 in each)
    """
    N, C, H, W = x.shape
    G = w1.shape[0]
    assert C == 4 * G

    H1 = (H + 1) // stride + 1             # conv_1 output spatial size
    W1 = (W + 1) // stride + 1
    H_out, W_out = H1 + 2, W1 + 2          # conv_2 / module output spatial size
    assert x_latter.shape == (N, C, H_out, W_out)

    # conv_1 samples that land on real (non-padded) pixels of x.  Every other
    # conv_1/conv_2 tap reads only zero padding and both convs are bias-free,
    # so blk == 0 there and the output is just x_latter (handled in-kernel).
    Hv, Wv = H // stride, W // stride
    xv = x[:, :, stride - 1::stride, stride - 1::stride]

    # Embed the samples at their position on the conv_2 output grid (offset 2
    # from the two paddings).  This is the only wrapper-side HBM pass; it keeps
    # everything in plain NCHW so the kernel needs no transposes/pads/scatters.
    xe = jnp.zeros((N, C, H_out, W_out), x.dtype)
    xe = xe.at[:, :, 2:2 + Hv, 2:2 + Wv].set(xv)

    S = H_out * W_out                      # flattened spatial = lane axis
    xe_flat = xe.reshape(N * C, S)         # contiguous reshape, no copy
    lat_flat = x_latter.reshape(N * C, S)
    w1_flat = w1.reshape(-1).astype(jnp.float32)   # index 4g+j
    w2_flat = w2.reshape(-1).astype(jnp.float32)

    # Row block = all channels of one batch element (keeps channel groups
    # whole); lane block = full spatial extent -> one big lane-dense block per
    # grid step; the batch grid axis is "parallel" for megacore sharding.
    # TODO(synk): for very large images (C*S*4B per stream beyond a few MiB),
    # add lane tiling (block S in multiples of 128) to respect scoped VMEM.
    if C % 8 == 0:
        row_block, n_row_blocks = C, N
    else:
        row_block, n_row_blocks = N * C, 1   # full-dim block is always legal

    out_flat = pl.pallas_call(
        functools.partial(_shortcut_kernel, channels=C),
        out_shape=jax.ShapeDtypeStruct((N * C, S), x.dtype),
        grid=(n_row_blocks,),
        in_specs=[
            pl.BlockSpec(memory_space=pltpu.MemorySpace.SMEM),    # w1
            pl.BlockSpec(memory_space=pltpu.MemorySpace.SMEM),    # w2
            pl.BlockSpec((row_block, S), lambda i: (i, 0)),       # xe
            pl.BlockSpec((row_block, S), lambda i: (i, 0)),       # x_latter
        ],
        out_specs=pl.BlockSpec((row_block, S), lambda i: (i, 0)),
        compiler_params=pltpu.CompilerParams(
            dimension_semantics=("parallel",)),
    )(w1_flat, w2_flat, xe_flat, lat_flat)

    return out_flat.reshape(N, C, H_out, W_out)


def _reference(x, x_latter, w1, w2, stride=1):
    """Pure-JAX reference using lax grouped convs (mirrors the PyTorch forward)."""
    N, C, H, W = x.shape
    G = w1.shape[0]
    w1_k = w1.reshape(G, 4, 1, 1)      # (out=G, in/groups=4, 1, 1)
    w2_k = w2.reshape(C, 1, 1, 1)      # (out=C, in/groups=1, 1, 1)
    blk = jax.lax.conv_general_dilated(
        x, w1_k, window_strides=(stride, stride), padding=((1, 1), (1, 1)),
        dimension_numbers=("NCHW", "OIHW", "NCHW"), feature_group_count=G)
    blk = jax.lax.conv_general_dilated(
        blk, w2_k, window_strides=(1, 1), padding=((1, 1), (1, 1)),
        dimension_numbers=("NCHW", "OIHW", "NCHW"), feature_group_count=G)
    return blk + x_latter


if __name__ == "__main__":
    key = jax.random.PRNGKey(0)
    k_x, k_l1, k_l2, k_w1, k_w2 = jax.random.split(key, 5)

    N, inplanes, H, W = 2, 8, 16, 16
    temp_planes = inplanes // 4          # = 2
    x = jax.random.normal(k_x, (N, inplanes, H, W), dtype=jnp.float32)
    # Deterministic synthetic weights (Conv2d shapes: (G,4,1,1) and (C,1,1,1)).
    w1 = 0.1 * jax.random.normal(k_w1, (temp_planes, 4), dtype=jnp.float32)
    w2 = 0.1 * jax.random.normal(k_w2, (inplanes,), dtype=jnp.float32)

    for stride, k_lat in ((1, k_l1), (2, k_l2)):
        H1 = (H + 1) // stride + 1       # conv_1 output spatial
        W1 = (W + 1) // stride + 1
        x_latter = jax.random.normal(
            k_lat, (N, inplanes, H1 + 2, W1 + 2), dtype=jnp.float32)

        out = shortcut_block(x, x_latter, w1, w2, stride=stride)
        out = jax.block_until_ready(out)

        ref = _reference(x, x_latter, w1, w2, stride=stride)
        assert out.shape == ref.shape == (N, inplanes, H1 + 2, W1 + 2)
        assert jnp.allclose(out, ref, atol=1e-4, rtol=1e-4), f"mismatch stride={stride}"

    print("KERNEL_OK")
</pallas_src>

<mosaic_0001>
module attributes {stable_mosaic.version = 11 : i64} {
  func.func @_shortcut_kernel(%arg0: i32, %arg1: memref<8xf32, #tpu.memory_space<smem>>, %arg2: memref<8xf32, #tpu.memory_space<smem>>, %arg3: memref<8x400xf32, #tpu.memory_space<vmem>>, %arg4: memref<8x400xf32, #tpu.memory_space<vmem>>, %arg5: memref<8x400xf32, #tpu.memory_space<vmem>>) attributes {dimension_semantics = [#tpu.dimension_semantics<parallel>], iteration_bounds = array<i64: 2>, scalar_prefetch = 0 : i64, scratch_operands = 0 : i64, tpu.core_type = #tpu.core_type<tc>, window_params = [{transform_indices = @transform_0, window_bounds = array<i64: 8>}, {transform_indices = @transform_1, window_bounds = array<i64: 8>}, {transform_indices = @transform_2, window_bounds = array<i64: 8, 400>}, {transform_indices = @transform_3, window_bounds = array<i64: 8, 400>}, {transform_indices = @transform_4, window_bounds = array<i64: 8, 400>}]} {
    %c0 = arith.constant 0 : index
    %0 = memref.load %arg1[%c0] : memref<8xf32, #tpu.memory_space<smem>>
    %c0_0 = arith.constant 0 : index
    %c0_1 = arith.constant 0 : index
    %1 = vector.load %arg3[%c0_0, %c0_1] : memref<8x400xf32, #tpu.memory_space<vmem>>, vector<1x400xf32>
    %2 = vector.broadcast %0 : f32 to vector<1x400xf32>
    %3 = arith.mulf %2, %1 : vector<1x400xf32>
    %c1 = arith.constant 1 : index
    %4 = memref.load %arg1[%c1] : memref<8xf32, #tpu.memory_space<smem>>
    %c1_2 = arith.constant 1 : index
    %c0_3 = arith.constant 0 : index
    %5 = vector.load %arg3[%c1_2, %c0_3] : memref<8x400xf32, #tpu.memory_space<vmem>>, vector<1x400xf32>
    %6 = vector.broadcast %4 : f32 to vector<1x400xf32>
    %7 = arith.mulf %6, %5 : vector<1x400xf32>
    %8 = arith.addf %3, %7 : vector<1x400xf32>
    %c2 = arith.constant 2 : index
    %9 = memref.load %arg1[%c2] : memref<8xf32, #tpu.memory_space<smem>>
    %c2_4 = arith.constant 2 : index
    %c0_5 = arith.constant 0 : index
    %10 = vector.load %arg3[%c2_4, %c0_5] : memref<8x400xf32, #tpu.memory_space<vmem>>, vector<1x400xf32>
    %11 = vector.broadcast %9 : f32 to vector<1x400xf32>
    %12 = arith.mulf %11, %10 : vector<1x400xf32>
    %13 = arith.addf %8, %12 : vector<1x400xf32>
    %c3 = arith.constant 3 : index
    %14 = memref.load %arg1[%c3] : memref<8xf32, #tpu.memory_space<smem>>
    %c3_6 = arith.constant 3 : index
    %c0_7 = arith.constant 0 : index
    %15 = vector.load %arg3[%c3_6, %c0_7] : memref<8x400xf32, #tpu.memory_space<vmem>>, vector<1x400xf32>
    %16 = vector.broadcast %14 : f32 to vector<1x400xf32>
    %17 = arith.mulf %16, %15 : vector<1x400xf32>
    %18 = arith.addf %13, %17 : vector<1x400xf32>
    %c0_8 = arith.constant 0 : index
    %19 = memref.load %arg2[%c0_8] : memref<8xf32, #tpu.memory_space<smem>>
    %20 = vector.broadcast %19 : f32 to vector<1x400xf32>
    %21 = arith.mulf %20, %18 : vector<1x400xf32>
    %c0_9 = arith.constant 0 : index
    %c0_10 = arith.constant 0 : index
    %22 = vector.load %arg4[%c0_9, %c0_10] : memref<8x400xf32, #tpu.memory_space<vmem>>, vector<1x400xf32>
    %23 = arith.addf %21, %22 : vector<1x400xf32>
    %c0_11 = arith.constant 0 : index
    %c0_12 = arith.constant 0 : index
    %24 = vector.load %arg5[%c0_11, %c0_12] : memref<8x400xf32, #tpu.memory_space<vmem>>, vector<1x400xf32>
    tpu.vector_store %arg5[%c0_11, %c0_12], %23 {strides = array<i32>} : memref<8x400xf32, #tpu.memory_space<vmem>>, vector<1x400xf32>,
    %c1_13 = arith.constant 1 : index
    %25 = memref.load %arg2[%c1_13] : memref<8xf32, #tpu.memory_space<smem>>
    %26 = vector.broadcast %25 : f32 to vector<1x400xf32>
    %27 = arith.mulf %26, %18 : vector<1x400xf32>
    %c1_14 = arith.constant 1 : index
    %c0_15 = arith.constant 0 : index
    %28 = vector.load %arg4[%c1_14, %c0_15] : memref<8x400xf32, #tpu.memory_space<vmem>>, vector<1x400xf32>
    %29 = arith.addf %27, %28 : vector<1x400xf32>
    %c1_16 = arith.constant 1 : index
    %c0_17 = arith.constant 0 : index
    %30 = vector.load %arg5[%c1_16, %c0_17] : memref<8x400xf32, #tpu.memory_space<vmem>>, vector<1x400xf32>
    tpu.vector_store %arg5[%c1_16, %c0_17], %29 {strides = array<i32>} : memref<8x400xf32, #tpu.memory_space<vmem>>, vector<1x400xf32>,
    %c2_18 = arith.constant 2 : index
    %31 = memref.load %arg2[%c2_18] : memref<8xf32, #tpu.memory_space<smem>>
    %32 = vector.broadcast %31 : f32 to vector<1x400xf32>
    %33 = arith.mulf %32, %18 : vector<1x400xf32>
    %c2_19 = arith.constant 2 : index
    %c0_20 = arith.constant 0 : index
    %34 = vector.load %arg4[%c2_19, %c0_20] : memref<8x400xf32, #tpu.memory_space<vmem>>, vector<1x400xf32>
    %35 = arith.addf %33, %34 : vector<1x400xf32>
    %c2_21 = arith.constant 2 : index
    %c0_22 = arith.constant 0 : index
    %36 = vector.load %arg5[%c2_21, %c0_22] : memref<8x400xf32, #tpu.memory_space<vmem>>, vector<1x400xf32>
    tpu.vector_store %arg5[%c2_21, %c0_22], %35 {strides = array<i32>} : memref<8x400xf32, #tpu.memory_space<vmem>>, vector<1x400xf32>,
    %c3_23 = arith.constant 3 : index
    %37 = memref.load %arg2[%c3_23] : memref<8xf32, #tpu.memory_space<smem>>
    %38 = vector.broadcast %37 : f32 to vector<1x400xf32>
    %39 = arith.mulf %38, %18 : vector<1x400xf32>
    %c3_24 = arith.constant 3 : index
    %c0_25 = arith.constant 0 : index
    %40 = vector.load %arg4[%c3_24, %c0_25] : memref<8x400xf32, #tpu.memory_space<vmem>>, vector<1x400xf32>
    %41 = arith.addf %39, %40 : vector<1x400xf32>
    %c3_26 = arith.constant 3 : index
    %c0_27 = arith.constant 0 : index
    %42 = vector.load %arg5[%c3_26, %c0_27] : memref<8x400xf32, #tpu.memory_space<vmem>>, vector<1x400xf32>
    tpu.vector_store %arg5[%c3_26, %c0_27], %41 {strides = array<i32>} : memref<8x400xf32, #tpu.memory_space<vmem>>, vector<1x400xf32>,
    %c4 = arith.constant 4 : index
    %43 = memref.load %arg1[%c4] : memref<8xf32, #tpu.memory_space<smem>>
    %c4_28 = arith.constant 4 : index
    %c0_29 = arith.constant 0 : index
    %44 = vector.load %arg3[%c4_28, %c0_29] : memref<8x400xf32, #tpu.memory_space<vmem>>, vector<1x400xf32>
    %45 = vector.broadcast %43 : f32 to vector<1x400xf32>
    %46 = arith.mulf %45, %44 : vector<1x400xf32>
    %c5 = arith.constant 5 : index
    %47 = memref.load %arg1[%c5] : memref<8xf32, #tpu.memory_space<smem>>
    %c5_30 = arith.constant 5 : index
    %c0_31 = arith.constant 0 : index
    %48 = vector.load %arg3[%c5_30, %c0_31] : memref<8x400xf32, #tpu.memory_space<vmem>>, vector<1x400xf32>
    %49 = vector.broadcast %47 : f32 to vector<1x400xf32>
    %50 = arith.mulf %49, %48 : vector<1x400xf32>
    %51 = arith.addf %46, %50 : vector<1x400xf32>
    %c6 = arith.constant 6 : index
    %52 = memref.load %arg1[%c6] : memref<8xf32, #tpu.memory_space<smem>>
    %c6_32 = arith.constant 6 : index
    %c0_33 = arith.constant 0 : index
    %53 = vector.load %arg3[%c6_32, %c0_33] : memref<8x400xf32, #tpu.memory_space<vmem>>, vector<1x400xf32>
    %54 = vector.broadcast %52 : f32 to vector<1x400xf32>
    %55 = arith.mulf %54, %53 : vector<1x400xf32>
    %56 = arith.addf %51, %55 : vector<1x400xf32>
    %c7 = arith.constant 7 : index
    %57 = memref.load %arg1[%c7] : memref<8xf32, #tpu.memory_space<smem>>
    %c7_34 = arith.constant 7 : index
    %c0_35 = arith.constant 0 : index
    %58 = vector.load %arg3[%c7_34, %c0_35] : memref<8x400xf32, #tpu.memory_space<vmem>>, vector<1x400xf32>
    %59 = vector.broadcast %57 : f32 to vector<1x400xf32>
    %60 = arith.mulf %59, %58 : vector<1x400xf32>
    %61 = arith.addf %56, %60 : vector<1x400xf32>
    %c4_36 = arith.constant 4 : index
    %62 = memref.load %arg2[%c4_36] : memref<8xf32, #tpu.memory_space<smem>>
    %63 = vector.broadcast %62 : f32 to vector<1x400xf32>
    %64 = arith.mulf %63, %61 : vector<1x400xf32>
    %c4_37 = arith.constant 4 : index
    %c0_38 = arith.constant 0 : index
    %65 = vector.load %arg4[%c4_37, %c0_38] : memref<8x400xf32, #tpu.memory_space<vmem>>, vector<1x400xf32>
    %66 = arith.addf %64, %65 : vector<1x400xf32>
    %c4_39 = arith.constant 4 : index
    %c0_40 = arith.constant 0 : index
    %67 = vector.load %arg5[%c4_39, %c0_40] : memref<8x400xf32, #tpu.memory_space<vmem>>, vector<1x400xf32>
    tpu.vector_store %arg5[%c4_39, %c0_40], %66 {strides = array<i32>} : memref<8x400xf32, #tpu.memory_space<vmem>>, vector<1x400xf32>,
    %c5_41 = arith.constant 5 : index
    %68 = memref.load %arg2[%c5_41] : memref<8xf32, #tpu.memory_space<smem>>
    %69 = vector.broadcast %68 : f32 to vector<1x400xf32>
    %70 = arith.mulf %69, %61 : vector<1x400xf32>
    %c5_42 = arith.constant 5 : index
    %c0_43 = arith.constant 0 : index
    %71 = vector.load %arg4[%c5_42, %c0_43] : memref<8x400xf32, #tpu.memory_space<vmem>>, vector<1x400xf32>
    %72 = arith.addf %70, %71 : vector<1x400xf32>
    %c5_44 = arith.constant 5 : index
    %c0_45 = arith.constant 0 : index
    %73 = vector.load %arg5[%c5_44, %c0_45] : memref<8x400xf32, #tpu.memory_space<vmem>>, vector<1x400xf32>
    tpu.vector_store %arg5[%c5_44, %c0_45], %72 {strides = array<i32>} : memref<8x400xf32, #tpu.memory_space<vmem>>, vector<1x400xf32>,
    %c6_46 = arith.constant 6 : index
    %74 = memref.load %arg2[%c6_46] : memref<8xf32, #tpu.memory_space<smem>>
    %75 = vector.broadcast %74 : f32 to vector<1x400xf32>
    %76 = arith.mulf %75, %61 : vector<1x400xf32>
    %c6_47 = arith.constant 6 : index
    %c0_48 = arith.constant 0 : index
    %77 = vector.load %arg4[%c6_47, %c0_48] : memref<8x400xf32, #tpu.memory_space<vmem>>, vector<1x400xf32>
    %78 = arith.addf %76, %77 : vector<1x400xf32>
    %c6_49 = arith.constant 6 : index
    %c0_50 = arith.constant 0 : index
    %79 = vector.load %arg5[%c6_49, %c0_50] : memref<8x400xf32, #tpu.memory_space<vmem>>, vector<1x400xf32>
    tpu.vector_store %arg5[%c6_49, %c0_50], %78 {strides = array<i32>} : memref<8x400xf32, #tpu.memory_space<vmem>>, vector<1x400xf32>,
    %c7_51 = arith.constant 7 : index
    %80 = memref.load %arg2[%c7_51] : memref<8xf32, #tpu.memory_space<smem>>
    %81 = vector.broadcast %80 : f32 to vector<1x400xf32>
    %82 = arith.mulf %81, %61 : vector<1x400xf32>
    %c7_52 = arith.constant 7 : index
    %c0_53 = arith.constant 0 : index
    %83 = vector.load %arg4[%c7_52, %c0_53] : memref<8x400xf32, #tpu.memory_space<vmem>>, vector<1x400xf32>
    %84 = arith.addf %82, %83 : vector<1x400xf32>
    %c7_54 = arith.constant 7 : index
    %c0_55 = arith.constant 0 : index
    %85 = vector.load %arg5[%c7_54, %c0_55] : memref<8x400xf32, #tpu.memory_space<vmem>>, vector<1x400xf32>
    tpu.vector_store %arg5[%c7_54, %c0_55], %84 {strides = array<i32>} : memref<8x400xf32, #tpu.memory_space<vmem>>, vector<1x400xf32>,
    return
  }
  func.func @transform_0(%arg0: i32) -> i32 {
    %c0_i32 = arith.constant 0 : i32
    %c0_i32_0 = arith.constant 0 : i32
    return %c0_i32 : i32
  }
  func.func @transform_1(%arg0: i32) -> i32 {
    %c0_i32 = arith.constant 0 : i32
    %c0_i32_0 = arith.constant 0 : i32
    return %c0_i32 : i32
  }
  func.func @transform_2(%arg0: i32) -> (i32, i32) {
    %c0_i32 = arith.constant 0 : i32
    %c0_i32_0 = arith.constant 0 : i32
    return %arg0, %c0_i32 : i32, i32
  }
  func.func @transform_3(%arg0: i32) -> (i32, i32) {
    %c0_i32 = arith.constant 0 : i32
    %c0_i32_0 = arith.constant 0 : i32
    return %arg0, %c0_i32 : i32, i32
  }
  func.func @transform_4(%arg0: i32) -> (i32, i32) {
    %c0_i32 = arith.constant 0 : i32
    %c0_i32_0 = arith.constant 0 : i32
    return %arg0, %c0_i32 : i32, i32
  }
}

</mosaic_0001>

<bundles_post_ra>
// kernel: tpu_custom_call.1
= control target key start
LH: loop header
LB: loop body
LE: loop exit
PB: predicated region body
PF: predicated region fallthrough
CT: control target
= control target key end

     0   :  { %s1124_s0 = inlined_call_operand.hbm [shape: f32[8], index: 0, kind: input, shape index: {}]   ;;  %s1125_s1 = inlined_call_operand.hbm [shape: f32[8], index: 1, kind: input, shape index: {}]   ;;  %s1126_s2 = inlined_call_operand.hbm [shape: f32[16,400], index: 2, kind: input, shape index: {}]   ;;  %s1127_s3 = inlined_call_operand.hbm [shape: f32[16,400], index: 3, kind: input, shape index: {}]   ;;  %s1128_s4 = inlined_call_operand.hbm [shape: f32[16,400], index: 4, kind: output, shape index: {}]  }
   0x1   :  { %1129 = sst [smem:[#allocation18_spill]] %s1124_s0 }
   0x2   :  { %1130 = sst [smem:[#allocation19_spill]] %s1125_s1 }
   0x3   :  { %9 = vsyncpa [#allocation5], 0 }
   0x4   :  { %10 = vsyncpa [#allocation7], 0 }
   0x5   :  { %11 = vsyncpa [#allocation3], 0 }
   0x6   :  { %13 = vsyncpa [#allocation3 + $0x1], 0 }
   0x7   :  { %14 = vsyncpa [#allocation10], 0 }
   0x8   :  { %16 = vsyncpa [#allocation10 + $0x1], 0 }
   0x9   :  { %17 = vsyncpa [#allocation4], 0 }
   0xa   :  { %19 = vsyncpa [#allocation4 + $0x1], 0  ;;  %s863_s15 = smov 0   ;;  %s865_s16 = smov 0  }
   0xb   :  { %s867_s17 = smov 0   ;;  %s869_s18 = smov 0  }
   0xc LB: > { %s884_s19 = sadd.s32 4294967295, %s834_s18   ;;  %s534_s20 = sadd.s32 4294967294, %s834_s18   ;;  %s834_s18 = sphi %s869_s18, %s1146_s18   ;;  %s830_s17 = sphi %s867_s17, %s1145_s17   ;;  %s826_s16 = sphi %s865_s16, %s1144_s16   ;;  %s822_s15 = sphi %s863_s15, %s1143_s15  }
   0xd   : > { %p87_p0 = scmp.ne.s32.totalorder %s826_s16, %s822_s15  ;;  %p88_p1 = scmp.eq.s32.totalorder %s884_s19, 0 }
   0xe   : > { %p137_p2 = scmp.eq.s32.totalorder %s884_s19, 1  ;;  %p143_p3 = scmp.eq.s32.totalorder %s534_s20, 1 }
   0xf   : > { %p893_p4 = por %p88_p1, %p87_p0  ;;  %p535_p5 = scmp.ge.s32.totalorder %s834_s18, 1 }
  0x10   : > { %p898_p6 = por %p143_p3, %p87_p0  ;;  %p150_p7 = scmp.lt.s32.totalorder %s834_s18, 3 }
  0x11   : > { %s1133_s0 = sld [smem:[#allocation18_spill]]  ;;  %s919_s30 = sadd.s32 1, %s834_s18  }
  0x12   : > { %p906_p8 = pnand %p535_p5, %p150_p7  ;;  %s1135_s1 = sld [smem:[#allocation19_spill]] }
  0x13   : > { %s71_s5 = ssub.s32 %s834_s18, %s919_s30  ;;  %s836_s6 = smov [#allocation2]  }
  0x14   : > { %p608_p10 = pneg %p906_p8  ;;  %s837_s7 = smov [#allocation6]  }
  0x15   : > { %p72_p12 = scmp.eq.s32.totalorder %s71_s5, 0  ;;  %s74_s8 = sadd.s32 1, %s830_s17 }
  0x16   : > { %p609_p11 = pnand %p608_p10, %p88_p1  ;;  %p81_p13 = scmp.ne.s32.totalorder %s830_s17, %s826_s16 }
  0x17   : > { %s162_s25 = sshll.u32 %s1133_s0, 4  ;;  %p82_p0 = scmp.eq.s32.totalorder %s834_s18, 0  ;;  %s163_s25 = int_to_ptr.hbm [resolvable:$true] %s162_s25 }
  0x18   : > { %s172_s29 = sshll.u32 %s1135_s1, 4  ;;  %p932_p5 = por %p137_p2, %p81_p13  ;;  %s173_s29 = int_to_ptr.hbm [resolvable:$true] %s172_s29 }
  0x19   : > { %611 = dma.hbm_to_smem (!%p609_p11), %s163_s25, 16, %s836_s6, [#allocation5]  }
  0x1a   : > { %614 = dma.hbm_to_smem (!%p609_p11), %s173_s29, 16, %s837_s7, [#allocation7]  }
  0x1b   : > { %s928_s9 = scalar_select %p72_p12, %s830_s17, %s74_s8  }
  0x1c   : > { %p83_p3 = por %p82_p0, %p81_p13  ;;  %p628_p7 = scmp.lt.s32.totalorder %s834_s18, 2 }
  0x1d   : > { %1136 = sst [smem:[#allocation17_spill]] %s928_s9  ;;  %s938_s11 = sand.u32 1, %s830_s17  }
  0x1e   : > { %s539_s12 = sshll.u32 %s938_s11, 5  ;;  %s591_s13 = sshll.u32 %s834_s18, 5 }
  0x1f   : > { %s192_s23 = scalar_lea.hbm %s1126_s2, %s591_s13  ;;  %s187_s24 = scalar_lea.vmem [#allocation8], %s539_s12 }
  0x20   : > { %s196_s25 = sshll.u32 %s187_s24, 4  ;;  %s194_s27 = sshll.u32 %s192_s23, 4  ;;  %s197_s25 = int_to_ptr.vmem [resolvable:$true] %s196_s25  ;;  %s195_s27 = int_to_ptr.hbm [resolvable:$true] %s194_s27 }
  0x21   : > { %p945_p2 = pnand %p628_p7, %p83_p3  ;;  %s212_s6 = scalar_lea.hbm %s1127_s3, %s591_s13 }
  0x22   : > { %s184_s7 = scalar_lea.sflag [#allocation3], %s938_s11  ;;  %s696_s8 = sshra.s32 %s195_s27, 4  ;;  %s697_s8 = int_to_ptr.hbm [resolvable:$true] %s696_s8 }
  0x23   : > { %s698_s14 = scalar_lea.hbm %s697_s8, 32  ;;  %p700_p11 = pneg %p945_p2 }
  0x24   : > { %p699_p10 = scmp.ne.s32.totalorder %s697_s8, %s698_s14  ;;  %s703_s24 = scalar_lea.hbm %s1126_s2, 64 }
  0x25   : > { %p704_p0 = scmp.lt.s32.totalorder %s697_s8, %s1126_s2  ;;  %p705_p3 = scmp.lt.s32.totalorder %s703_s24, %s698_s14 }
  0x26   : > { %p701_p12 = pnand %p700_p11, %p699_p10 }
  0x27   : > { %p706_p7 = por %p705_p3, %p704_p0 }
  0x28   : > { %p702_p13 = pneg %p701_p12 }
  0x2a   : > { %p707_p9 = pnand %p706_p7, %p702_p13 }
  0x2c   : > { %710 = shalt.err (!%p707_p9)
}
  0x2d   : > { %618 = dma.hbm_to_vmem [thread:$0]  (!%p945_p2), %s195_s27, 512, %s197_s25, %s184_s7  }
  0x2e   : > { %s214_s13 = sshll.u32 %s212_s6, 4  ;;  %s207_s5 = scalar_lea.vmem [#allocation9], %s539_s12  ;;  %s215_s13 = int_to_ptr.hbm [resolvable:$true] %s214_s13 }
  0x2f   : > { %s216_s1 = sshll.u32 %s207_s5, 4  ;;  %s204_s20 = scalar_lea.sflag [#allocation10], %s938_s11  ;;  %s217_s1 = int_to_ptr.vmem [resolvable:$true] %s216_s1 }
  0x30   : > { %s726_s23 = sshra.s32 %s215_s13, 4  ;;  %s733_s14 = scalar_lea.hbm %s1127_s3, 64  ;;  %s727_s23 = int_to_ptr.hbm [resolvable:$true] %s726_s23 }
  0x31   : > { %s728_s9 = scalar_lea.hbm %s727_s23, 32  ;;  %p734_p9 = scmp.lt.s32.totalorder %s727_s23, %s1127_s3 }
  0x32   : > { %p729_p10 = scmp.ne.s32.totalorder %s727_s23, %s728_s9  ;;  %p735_p0 = scmp.lt.s32.totalorder %s733_s14, %s728_s9 }
  0x34   : > { %p731_p12 = pnand %p729_p10, %p700_p11  ;;  %p736_p3 = por %p735_p0, %p734_p9 }
  0x36   : > { %p732_p13 = pneg %p731_p12 }
  0x38   : > { %p737_p7 = pnand %p736_p3, %p732_p13 }
  0x3a   : > { %740 = shalt.err (!%p737_p7)
}
  0x3b   : > { %621 = dma.hbm_to_vmem [thread:$0]  (!%p945_p2), %s215_s13, 512, %s217_s1, %s204_s20  }
  0x3c   : > { %225 = sbr.rel (%p906_p8) target bundleno = 111 (0x6f), region = 36 }
  0x41   : > { %801 = dma.done.wait (%p88_p1), [#allocation5], 16  }
  0x42   : > { %803 = vsyncadd (%p88_p1), [#allocation5], 4294967280 }
  0x43   : > { %805 = dma.done.wait (%p88_p1), [#allocation7], 16  }
  0x44   : > { %807 = vsyncadd (%p88_p1), [#allocation7], 4294967280  ;;  %s989_s9 = sand.u32 1, %s826_s16  }
  0x45   : > { %s992_s1 = sshll.u32 %s989_s9, 5  ;;  %s238_s26 = scalar_lea.sflag [#allocation3], %s989_s9 }
  0x46   : > { %s996_s11 = scalar_lea.vmem [#allocation8], %s992_s1 }
  0x47   : > { %809 = dma.done.wait (%p893_p4), %s238_s26, 512  }
  0x48   : > { %811 = vsyncadd (%p893_p4), %s238_s26, 4294966784  ;;  %s248_s12 = scalar_lea.sflag [#allocation10], %s989_s9  ;;  %s1004_s27 = scalar_lea.vmem [#allocation9], %s992_s1 }
  0x49   : > { %813 = dma.done.wait (%p893_p4), %s248_s12, 512  }
  0x4a   : > { %815 = vsyncadd (%p893_p4), %s248_s12, 4294966784 }
  0x4b   : > { %257 = sfence }
  0x4c   : > { %s283_s28 = sld [smem:[#allocation2]]  ;;  %v284_v0 = vld [vmem:[%s996_s11] ss:$8 sm:$0xf]  ;;  %v310_v14 = vlaneseq }
  0x4d   : > { %s551_s6 = sld [smem:[#allocation2 + $0x1]]  ;;  %v552_v1 = vld [vmem:[%s996_s11 + $0x1] ss:$8 sm:$0xf] }
  0x4e   : > { %s553_s7 = sld [smem:[#allocation2 + $0x2]]  ;;  %v554_v3 = vld [vmem:[%s996_s11 + $0x2] ss:$8 sm:$0xf]  ;;  %vm1049_vm0 = vcmp.lt.s32.totalorder %v310_v14, 400 }
  0x4f   : > { %s555_s29 = sld [smem:[#allocation2 + $0x3]]  ;;  %v556_v6 = vld [vmem:[%s996_s11 + $0x3] ss:$8 sm:$0xf] }
  0x50   : > { %s1011_s13 = sld [smem:[#allocation6]]  ;;  %v567_v15 = vld [vmem:[%s996_s11 + $0x4] ss:$8 sm:$0xf] }
  0x51   : > { %s1014_s5 = sld [smem:[#allocation6 + $0x1]]  ;;  %v308_v17 = vld [vmem:[%s1004_s27] ss:$8 sm:$0xf] }
  0x52   : > { %v285_v2 = vstv %s283_s28  ;;  %s1017_s20 = sld [smem:[#allocation6 + $0x2]]  ;;  %v558_v19 = vld [vmem:[%s1004_s27 + $0x1] ss:$8 sm:$0xf]  ;;  %s593_s28 = sshll.u32 %s884_s19, 5 }
  0x53   : > { %v286_v4 = vmul.f32 %v285_v2, %v284_v0  ;;  %v290_v5 = vstv %s551_s6  ;;  %s1020_s21 = sld [smem:[#allocation6 + $0x3]]  ;;  %v561_v21 = vld [vmem:[%s1004_s27 + $0x2] ss:$8 sm:$0xf]  ;;  %s414_s19 = scalar_lea.hbm %s1128_s4, %s593_s28 }
  0x54   : > { %v291_v7 = vmul.f32 %v552_v1, %v290_v5  ;;  %v296_v8 = vstv %s553_s7  ;;  %s566_s23 = sld [smem:[#allocation2 + $0x4]]  ;;  %v569_v25 = vld [vmem:[%s996_s11 + $0x5] ss:$8 sm:$0xf] }
  0x55   : > { %v297_v9 = vmul.f32 %v554_v3, %v296_v8  ;;  %v302_v10 = vstv %s555_s29  ;;  %s1022_s0 = sld [smem:[#allocation2 + $0x5]]  ;;  %v564_v26 = vld [vmem:[%s1004_s27 + $0x3] ss:$8 sm:$0xf]  ;;  %s418_s29 = sshll.u32 %s414_s19, 4  ;;  %s419_s29 = int_to_ptr.hbm [resolvable:$true] %s418_s29 }
  0x56   : > { %v292_v11 = vadd.f32 %v291_v7, %v286_v4  ;;  %v303_v12 = vmul.f32 %v556_v6, %v302_v10  ;;  %s1024_s8 = sld [smem:[#allocation2 + $0x6]]  ;;  %v306_v16 = vstv %s1011_s13  ;;  %v571_v33 = vld [vmem:[%s996_s11 + $0x6] ss:$8 sm:$0xf]  ;;  %s770_s13 = sshra.s32 %s419_s29, 4  ;;  %s771_s13 = int_to_ptr.hbm [resolvable:$true] %s770_s13 }
  0x57   : > { %s1026_s14 = sld [smem:[#allocation2 + $0x7]]  ;;  %v317_v18 = vstv %s1014_s5  ;;  %v573_v34 = vld [vmem:[%s996_s11 + $0x7] ss:$8 sm:$0xf]  ;;  %s1056_s11 = scalar_lea.vmem [#allocation11], %s992_s1 }
  0x58   : > { %v298_v13 = vadd.f32 %v297_v9, %v292_v11  ;;  %s1029_s24 = sld [smem:[#allocation6 + $0x4]]  ;;  %v326_v20 = vstv %s1017_s20  ;;  %v575_v52 = vld [vmem:[%s1004_s27 + $0x4] ss:$8 sm:$0xf]  ;;  %s416_s7 = sshll.u32 %s1056_s11, 4  ;;  %s417_s7 = int_to_ptr.vmem [resolvable:$true] %s416_s7 }
  0x59   : > { %v335_v22 = vstv %s1020_s21  ;;  %s1038_s25 = sld [smem:[#allocation6 + $0x5]]  ;;  %v578_v53 = vld [vmem:[%s1004_s27 + $0x5] ss:$8 sm:$0xf]  ;;  %s772_s5 = scalar_lea.hbm %s771_s13, 32 }
  0x5a   : > { %v304_v23 = vadd.f32 %v303_v12, %v298_v13  ;;  %v346_v24 = vstv %s566_s23  ;;  %s1041_s26 = sld [smem:[#allocation6 + $0x6]]  ;;  %v581_v54 = vld [vmem:[%s1004_s27 + $0x6] ss:$8 sm:$0xf]  ;;  %p773_p1 = scmp.ne.s32.totalorder %s771_s13, %s772_s5 }
  0x5b   : > { %v347_v27 = vmul.f32 %v567_v15, %v346_v24  ;;  %v351_v28 = vstv %s1022_s0  ;;  %s1045_s12 = sld [smem:[#allocation6 + $0x7]]  ;;  %v584_v59 = vld [vmem:[%s1004_s27 + $0x7] ss:$8 sm:$0xf]  ;;  %s403_s27 = scalar_lea.sflag [#allocation4], %s989_s9 }
  0x5c   : > { %v307_v29 = vmul.f32 %v306_v16, %v304_v23  ;;  %v318_v30 = vmul.f32 %v317_v18, %v304_v23  ;;  %v327_v31 = vmul.f32 %v326_v20, %v304_v23  ;;  %v336_v32 = vmul.f32 %v335_v22, %v304_v23  ;;  %p774_p4 = pnand %p773_p1, %p932_p5  ;;  %s776_s23 = scalar_lea.hbm %s1128_s4, 64 }
  0x5d   : > { %v352_v36 = vmul.f32 %v569_v25, %v351_v28  ;;  %v357_v37 = vstv %s1024_s8  ;;  %v363_v38 = vstv %s1026_s14  ;;  %p777_p2 = scmp.lt.s32.totalorder %s771_s13, %s1128_s4  ;;  %p778_p11 = scmp.lt.s32.totalorder %s776_s23, %s772_s5 }
  0x5e   : > { %v309_v39 = vadd.f32 %v308_v17, %v307_v29  ;;  %v321_v40 = vadd.f32 %v558_v19, %v318_v30  ;;  %v330_v41 = vadd.f32 %v561_v21, %v327_v31  ;;  %v339_v42 = vadd.f32 %v564_v26, %v336_v32  ;;  %p775_p8 = pneg %p774_p4 }
  0x5f   : > { %v353_v43 = vadd.f32 %v352_v36, %v347_v27  ;;  %v358_v44 = vmul.f32 %v571_v33, %v357_v37  ;;  %v364_v45 = vmul.f32 %v573_v34, %v363_v38  ;;  %v367_v47 = vstv %s1029_s24  ;;  %p779_p10 = por %p778_p11, %p777_p2 }
  0x60   : > { %314 = vst.msk [vmem:[%s1056_s11] ss:$8 sm:$0xf] %vm1049_vm0, %v309_v39  ;;  %v376_v48 = vstv %s1038_s25  ;;  %v385_v49 = vstv %s1041_s26 }
  0x61   : > { %559 = vst.msk [vmem:[%s1056_s11 + $0x1] ss:$8 sm:$0xf] %vm1049_vm0, %v321_v40  ;;  %v359_v46 = vadd.f32 %v358_v44, %v353_v43  ;;  %v394_v50 = vstv %s1045_s12  ;;  %p780_p12 = pnand %p779_p10, %p775_p8 }
  0x62   : > { %562 = vst.msk [vmem:[%s1056_s11 + $0x2] ss:$8 sm:$0xf] %vm1049_vm0, %v330_v41 }
  0x63   : > { %565 = vst.msk [vmem:[%s1056_s11 + $0x3] ss:$8 sm:$0xf] %vm1049_vm0, %v339_v42  ;;  %v365_v51 = vadd.f32 %v364_v45, %v359_v46 }
  0x65   : > { %v368_v55 = vmul.f32 %v367_v47, %v365_v51  ;;  %v377_v56 = vmul.f32 %v376_v48, %v365_v51  ;;  %v386_v57 = vmul.f32 %v385_v49, %v365_v51  ;;  %v395_v58 = vmul.f32 %v394_v50, %v365_v51 }
  0x67   : > { %v371_v60 = vadd.f32 %v575_v52, %v368_v55  ;;  %v380_v61 = vadd.f32 %v578_v53, %v377_v56  ;;  %v389_v62 = vadd.f32 %v581_v54, %v386_v57  ;;  %v398_v63 = vadd.f32 %v584_v59, %v395_v58 }
  0x69   : > { %576 = vst.msk [vmem:[%s1056_s11 + $0x4] ss:$8 sm:$0xf] %vm1049_vm0, %v371_v60 }
  0x6a   : > { %579 = vst.msk [vmem:[%s1056_s11 + $0x5] ss:$8 sm:$0xf] %vm1049_vm0, %v380_v61 }
  0x6b   : > { %582 = vst.msk [vmem:[%s1056_s11 + $0x6] ss:$8 sm:$0xf] %vm1049_vm0, %v389_v62 }
  0x6c   : > { %585 = vst.msk [vmem:[%s1056_s11 + $0x7] ss:$8 sm:$0xf] %vm1049_vm0, %v398_v63 }
  0x6d   : > { %783 = shalt.err (!%p780_p12)
}
  0x6e   : > { %606 = dma.vmem_to_hbm [thread:$0]  (%p932_p5), %s417_s7, 512, %s419_s29, %s403_s27  }
  0x6f PF: > { %s430_s9 = sand.u32 1, %s822_s15   ;;  %p1141_p13 = scmp.ge.s32.totalorder %s834_s18, 2 }
  0x70   : > { %s431_s14 = scalar_lea.sflag [#allocation4], %s430_s9 }
  0x71   : > { %p623_p9 = pnand %p1141_p13, %p898_p6 }
  0x73   : > { %p624_p0 = pneg %p623_p9 }
  0x75   : > { %817 = dma.done.wait (%p624_p0), %s431_s14, 512  }
  0x76   : > { %819 = vsyncadd (%p624_p0), %s431_s14, 4294966784  ;;  %s1142_s24 = sld [smem:[#allocation17_spill]]  ;;  %p22_p3 = scmp.ge.s32.totalorder %s919_s30, 4  }
  0x77   : > { %s1143_s15 = smov %s826_s16  ;;  %s1144_s16 = smov %s830_s17 }
  0x78   : > { %s1146_s18 = smov %s919_s30  ;;  %24 = sbr.rel (!%p22_p3) target bundleno = 12 (0xc), region = 124 }
  0x7c   : > { %s1145_s17 = smov %s1142_s24 }
  0x7d   :  { %437 = vsyncpa [#allocation3], 1 }
  0x7e   :  { %439 = vsyncpa [#allocation3 + $0x1], 1 }
  0x7f   :  { %440 = vsyncpa [#allocation10], 1 }
  0x80   :  { %442 = vsyncpa [#allocation10 + $0x1], 1 }
  0x81   :  { %443 = vsyncpa [#allocation4], 1 }
  0x82   :  { %445 = vsyncpa [#allocation4 + $0x1], 1 }
  0x83   :  { %446 = vsyncpa [#allocation5], 1 }
  0x84   :  { %448 = vsyncpa [#allocation5 + $0x1], 1 }
  0x85   :  { %449 = vsyncpa [#allocation7], 1 }

</bundles_post_ra>
